<compile_context>
chip_gen: v7x
topology: tpu7x:2x2x1
jax: 0.10.0
libtpu: 0.0.40
codegen_flags: <defaults>
</compile_context>

<pallas_src>
import functools

import jax
import jax.numpy as jnp
from jax import lax
from jax.experimental import pallas as pl
from jax.experimental.pallas import tpu as pltpu

EPS = 1e-5
LANE = 128                      # channel padding granularity (256 fills a full
                                # v6e/v7x MXU tile; 128 keeps padding waste low
                                # for small channel counts and is v5e-native).
_VMEM_LIMIT = 32 * 1024 * 1024  # explicit scoped-VMEM limit, safe on v5e/v6e/v7x


def _round_up(x, m):
    return (x + m - 1) // m * m


# ----------------------------- pass 1 ---------------------------------------
# z = x @ [w1 | w_downsample]  (single fused bf16 MXU matmul), split into the
# conv1 output and the residual, and accumulate BN1 sum / sum-of-squares.
def _pass1_kernel(cpad, x_ref, w_ref, y1_ref, r_ref, st_ref):
    i = pl.program_id(1)
    z = jnp.dot(x_ref[0], w_ref[...], preferred_element_type=jnp.float32)
    y1 = z[:, :cpad]                       # conv1 output   (T_TILE, Cpad)
    y1_ref[0] = y1
    r_ref[0] = z[:, cpad:]                 # residual branch (T_TILE, Cpad)

    s = jnp.sum(y1, axis=0, keepdims=True)
    sq = jnp.sum(y1 * y1, axis=0, keepdims=True)

    @pl.when(i == 0)
    def _():
        st_ref[...] = jnp.zeros_like(st_ref)

    st_ref[...] += jnp.concatenate([s, sq], axis=0)[None]


# ----------------------------- pass 2 ---------------------------------------
# h = PReLU1(BN1(y1)) (folded affine), y2 = h @ w2, accumulate BN2 stats.
def _pass2_kernel(t_true, t_tile, y1_ref, s1_ref, b1_ref, a1_ref, w2_ref,
                  y2_ref, st_ref):
    i = pl.program_id(1)
    h = y1_ref[0] * s1_ref[...] + b1_ref[...]          # folded BN1: y*scale+shift
    a1 = a1_ref[0]                                      # PReLU slope from SMEM
    h = jnp.where(h >= 0.0, h, a1 * h)

    # Zero padded time rows so they don't pollute the BN2 statistics.
    t_idx = i * t_tile + lax.broadcasted_iota(jnp.int32, (t_tile, 1), 0)
    h = jnp.where(t_idx < t_true, h, 0.0)

    y2 = jnp.dot(h.astype(jnp.bfloat16), w2_ref[...],
                 preferred_element_type=jnp.float32)
    y2_ref[0] = y2

    s = jnp.sum(y2, axis=0, keepdims=True)
    sq = jnp.sum(y2 * y2, axis=0, keepdims=True)

    @pl.when(i == 0)
    def _():
        st_ref[...] = jnp.zeros_like(st_ref)

    st_ref[...] += jnp.concatenate([s, sq], axis=0)[None]


# ----------------------------- pass 3 ---------------------------------------
# BN2 (folded) + residual + PReLU2 + MaxPool1d(3).  Inputs arrive as
# (TP, 3*Cpad): the 3 pooling phases are contiguous 128-aligned lane groups.
def _pass3_kernel(cpad, y2_ref, r_ref, s2_ref, b2_ref, a2_ref, o_ref):
    y = y2_ref[0]
    r = r_ref[0]
    s2 = s2_ref[...]
    b2 = b2_ref[...]
    a2 = a2_ref[0]

    def phase(m):
        lo, hi = m * cpad, (m + 1) * cpad
        v = y[:, lo:hi] * s2 + b2 + r[:, lo:hi]
        return jnp.where(v >= 0.0, v, a2 * v)

    p = jnp.maximum(jnp.maximum(phase(0), phase(1)), phase(2))
    o_ref[0] = p.astype(o_ref.dtype)


# ----------------------------- wrapper ---------------------------------------
def resblock_forward(x_ncw, params):
    """x_ncw: (B, C_in, T) float32, matching the PyTorch Conv1d input layout."""
    B, Cin, T = x_ncw.shape
    Cout = params["w1"].shape[0]
    Tout = T // 3

    f32 = jnp.float32
    Cpad = _round_up(Cout, LANE)
    # TP = pooled-time rows per pass-3 block; T_TILE = 3*TP input-time rows per
    # block (multiple of 16 so the bf16 x block is sublane aligned).
    TP = min(128, _round_up(max(Tout, 1), 16))
    T_TILE = 3 * TP
    T_pad = _round_up(T, T_TILE)
    Tout_pad = T_pad // 3
    n_tt = T_pad // T_TILE
    n_tp = Tout_pad // TP
    N = float(B * T)                               # true BN sample count

    # ---- layout plumbing + weight prep (XLA side) ----
    x_btc = jnp.transpose(x_ncw, (0, 2, 1)).astype(f32)        # (B, T, Cin)
    x_btc = jnp.pad(x_btc, ((0, 0), (0, T_pad - T), (0, 0))).astype(jnp.bfloat16)

    def pad_cols(w_t):                                          # (., Cout)->(., Cpad)
        return jnp.pad(w_t, ((0, 0), (0, Cpad - Cout)))

    w1_t = pad_cols(params["w1"][:, :, 0].T.astype(f32))        # (Cin, Cpad)
    wd_t = pad_cols(params["wd"][:, :, 0].T.astype(f32))        # (Cin, Cpad)
    w1d = jnp.concatenate([w1_t, wd_t], axis=1).astype(jnp.bfloat16)  # fused
    w2_t = jnp.pad(params["w2"][:, :, 0].T.astype(f32),
                   ((0, Cpad - Cout), (0, Cpad - Cout))).astype(jnp.bfloat16)

    def pad_vec(v):
        return jnp.pad(v.astype(f32), (0, Cpad - Cout))

    g1, b1 = pad_vec(params["g1"]), pad_vec(params["b1"])
    g2, b2 = pad_vec(params["g2"]), pad_vec(params["b2"])
    a1 = params["a1"].astype(f32).reshape(1)
    a2 = params["a2"].astype(f32).reshape(1)

    smem_spec = pl.BlockSpec(memory_space=pltpu.MemorySpace.SMEM)
    vec_spec = pl.BlockSpec((1, Cpad), lambda b, i: (0, 0))
    tile_spec = pl.BlockSpec((1, T_TILE, Cpad), lambda b, i: (b, i, 0))
    stat_spec = pl.BlockSpec((1, 2, Cpad), lambda b, i: (b, 0, 0))

    # ---- pass 1: fused conv1 + downsample conv, BN1 statistics ----
    y1, resid, st1 = pl.pallas_call(
        functools.partial(_pass1_kernel, Cpad),
        grid=(B, n_tt),
        in_specs=[
            pl.BlockSpec((1, T_TILE, Cin), lambda b, i: (b, i, 0)),
            pl.BlockSpec((Cin, 2 * Cpad), lambda b, i: (0, 0)),
        ],
        out_specs=[tile_spec, tile_spec, stat_spec],
        out_shape=[
            jax.ShapeDtypeStruct((B, T_pad, Cpad), f32),
            jax.ShapeDtypeStruct((B, T_pad, Cpad), f32),
            jax.ShapeDtypeStruct((B, 2, Cpad), f32),
        ],
        compiler_params=pltpu.CompilerParams(
            dimension_semantics=("parallel", "arbitrary"),
            vmem_limit_bytes=_VMEM_LIMIT),
    )(x_btc, w1d)

    def fold_bn(st, gamma, beta):
        # single-pass stats: var = E[y^2] - mu^2, folded into y*scale + shift
        ssum = jnp.sum(st[:, 0, :], axis=0)
        ssq = jnp.sum(st[:, 1, :], axis=0)
        mu = ssum / N
        var = jnp.maximum(ssq / N - mu * mu, 0.0)
        inv = gamma * lax.rsqrt(var + EPS)
        return inv.reshape(1, Cpad), (beta - mu * inv).reshape(1, Cpad)

    scale1, shift1 = fold_bn(st1, g1, b1)

    # ---- pass 2: BN1-apply + PReLU1 + conv2 + BN2 statistics ----
    y2, st2 = pl.pallas_call(
        functools.partial(_pass2_kernel, T, T_TILE),
        grid=(B, n_tt),
        in_specs=[
            tile_spec, vec_spec, vec_spec, smem_spec,
            pl.BlockSpec((Cpad, Cpad), lambda b, i: (0, 0)),
        ],
        out_specs=[tile_spec, stat_spec],
        out_shape=[
            jax.ShapeDtypeStruct((B, T_pad, Cpad), f32),
            jax.ShapeDtypeStruct((B, 2, Cpad), f32),
        ],
        compiler_params=pltpu.CompilerParams(
            dimension_semantics=("parallel", "arbitrary"),
            vmem_limit_bytes=_VMEM_LIMIT),
    )(y1, scale1, shift1, a1, w2_t)

    scale2, shift2 = fold_bn(st2, g2, b2)

    # ---- pass 3: BN2-apply + residual + PReLU2 + MaxPool1d(3) ----
    # Free row-major views: (B, T_pad, Cpad) == (B, Tout_pad, 3*Cpad); the three
    # time-phases of each pooling window become contiguous 128-aligned lanes.
    y2v = y2.reshape(B, Tout_pad, 3 * Cpad)
    rv = resid.reshape(B, Tout_pad, 3 * Cpad)

    pooled = pl.pallas_call(
        functools.partial(_pass3_kernel, Cpad),
        grid=(B, n_tp),
        in_specs=[
            pl.BlockSpec((1, TP, 3 * Cpad), lambda b, j: (b, j, 0)),
            pl.BlockSpec((1, TP, 3 * Cpad), lambda b, j: (b, j, 0)),
            vec_spec, vec_spec, smem_spec,
        ],
        out_specs=pl.BlockSpec((1, TP, Cpad), lambda b, j: (b, j, 0)),
        out_shape=jax.ShapeDtypeStruct((B, Tout_pad, Cpad), f32),
        compiler_params=pltpu.CompilerParams(
            dimension_semantics=("parallel", "parallel"),
            vmem_limit_bytes=_VMEM_LIMIT),
    )(y2v, rv, scale2, shift2, a2)

    # slice off channel/time padding, back to PyTorch's (B, Cout, Tout) layout
    return jnp.transpose(pooled[:, :Tout, :Cout], (0, 2, 1))


# ----------------------------- reference -------------------------------------
def resblock_ref(x, params, matmul_dtype=jnp.float32):
    """Pure-JAX reference of the PyTorch forward (training-mode BN).
    matmul_dtype=bf16 reproduces the kernel's MXU operand precision exactly."""
    cast = lambda a: a.astype(matmul_dtype)
    w1 = params["w1"][:, :, 0]
    w2 = params["w2"][:, :, 0]
    wd = params["wd"][:, :, 0]

    def mm(w, h):
        return jnp.einsum("oc,bct->bot", cast(w), cast(h),
                          preferred_element_type=jnp.float32)

    def bn(y, g, b):
        mu = y.mean(axis=(0, 2), keepdims=True)
        var = ((y - mu) ** 2).mean(axis=(0, 2), keepdims=True)
        return (y - mu) * lax.rsqrt(var + EPS) * g[None, :, None] + b[None, :, None]

    def prelu(y, a):
        return jnp.where(y >= 0.0, y, a * y)

    y = prelu(bn(mm(w1, x), params["g1"], params["b1"]), params["a1"])
    y = bn(mm(w2, y), params["g2"], params["b2"])
    y = y + mm(wd, x)
    y = prelu(y, params["a2"])
    B, C, T = y.shape
    Tout = T // 3
    return y[:, :, : Tout * 3].reshape(B, C, Tout, 3).max(axis=-1)


if __name__ == "__main__":
    B, Cin, Cout, T = 2, 16, 32, 24       # in_dims != out_dims -> downsample branch
    key = jax.random.PRNGKey(0)
    ks = jax.random.split(key, 8)

    x = jax.random.normal(ks[0], (B, Cin, T), jnp.float32)
    params = dict(
        # Conv1d weights: (out_channels, in_channels, kernel_size=1)
        w1=0.1 * jax.random.normal(ks[1], (Cout, Cin, 1), jnp.float32),
        w2=0.1 * jax.random.normal(ks[2], (Cout, Cout, 1), jnp.float32),
        wd=0.1 * jax.random.normal(ks[3], (Cout, Cin, 1), jnp.float32),
        # BatchNorm1d affine params, shape (out_dims,)
        g1=1.0 + 0.1 * jax.random.normal(ks[4], (Cout,), jnp.float32),
        b1=0.1 * jax.random.normal(ks[5], (Cout,), jnp.float32),
        g2=1.0 + 0.1 * jax.random.normal(ks[6], (Cout,), jnp.float32),
        b2=0.1 * jax.random.normal(ks[7], (Cout,), jnp.float32),
        # PReLU default: a single shared slope initialized to 0.25
        a1=jnp.array([0.25], jnp.float32),
        a2=jnp.array([0.25], jnp.float32),
    )

    out = jax.block_until_ready(jax.jit(resblock_forward)(x, params))
    assert out.shape == (B, Cout, T // 3), out.shape

    # Tight check vs a reference that rounds matmul operands to bf16 exactly as
    # the kernel's MXU path does (validates kernel structure / BN math).
    ref_bf16 = jax.block_until_ready(resblock_ref(x, params, jnp.bfloat16))
    err_b = float(jnp.max(jnp.abs(out - ref_bf16)))
    assert jnp.allclose(out, ref_bf16, rtol=5e-3, atol=5e-3), err_b

    # Loose check vs the full-f32 PyTorch-equivalent reference (difference is
    # only bf16 operand rounding on the MXU).
    ref_f32 = jax.block_until_ready(resblock_ref(x, params, jnp.float32))
    err_f = float(jnp.max(jnp.abs(out - ref_f32)))
    assert jnp.allclose(out, ref_f32, rtol=5e-2, atol=5e-2), err_f

    print("KERNEL_OK")
</pallas_src>

<mosaic_0001>
module attributes {stable_mosaic.version = 11 : i64} {
  func.func @_pass1_kernel(%arg0: i32, %arg1: i32, %arg2: memref<1x48x16xbf16, #tpu.memory_space<vmem>>, %arg3: memref<16x256xbf16, #tpu.memory_space<vmem>>, %arg4: memref<1x48x128xf32, #tpu.memory_space<vmem>>, %arg5: memref<1x48x128xf32, #tpu.memory_space<vmem>>, %arg6: memref<1x2x128xf32, #tpu.memory_space<vmem>>) attributes {dimension_semantics = [#tpu.dimension_semantics<parallel>, #tpu.dimension_semantics<arbitrary>], iteration_bounds = array<i64: 2, 1>, scalar_prefetch = 0 : i64, scratch_operands = 0 : i64, tpu.core_type = #tpu.core_type<tc>, window_params = [{transform_indices = @transform_0, window_bounds = array<i64: 1, 48, 16>}, {pipeline_mode = #tpu.pipeline_mode<synchronous>, transform_indices = @transform_1, window_bounds = array<i64: 16, 256>}, {transform_indices = @transform_2, window_bounds = array<i64: 1, 48, 128>}, {transform_indices = @transform_3, window_bounds = array<i64: 1, 48, 128>}, {transform_indices = @transform_4, window_bounds = array<i64: 1, 2, 128>}]} {
    %c0 = arith.constant 0 : index
    %c0_0 = arith.constant 0 : index
    %c0_1 = arith.constant 0 : index
    %0 = vector.load %arg2[%c0, %c0_0, %c0_1] : memref<1x48x16xbf16, #tpu.memory_space<vmem>>, vector<1x48x16xbf16>
    %1 = vector.shape_cast %0 : vector<1x48x16xbf16> to vector<48x16xbf16>
    %c0_2 = arith.constant 0 : index
    %c0_3 = arith.constant 0 : index
    %2 = vector.load %arg3[%c0_2, %c0_3] : memref<16x256xbf16, #tpu.memory_space<vmem>>, vector<16x256xbf16>
    %cst = arith.constant dense<0.000000e+00> : vector<48x256xf32>
    %3 = tpu.matmul %1, %2, %cst {dimension_numbers = #tpu.dot_dimension_numbers<[1], [0], [0], [1], [0, 0, 1, 1], [], []>} : vector<48x16xbf16>, vector<16x256xbf16>, vector<48x256xf32> -> vector<48x256xf32>
    %4 = vector.extract_strided_slice %3 {offsets = [0, 0], sizes = [48, 128], strides = [1, 1]} : vector<48x256xf32> to vector<48x128xf32>
    %c0_4 = arith.constant 0 : index
    %c0_5 = arith.constant 0 : index
    %c0_6 = arith.constant 0 : index
    %5 = vector.load %arg4[%c0_4, %c0_5, %c0_6] : memref<1x48x128xf32, #tpu.memory_space<vmem>>, vector<1x48x128xf32>
    %6 = vector.shape_cast %5 : vector<1x48x128xf32> to vector<48x128xf32>
    %7 = vector.shape_cast %4 : vector<48x128xf32> to vector<1x48x128xf32>
    tpu.vector_store %arg4[%c0_4, %c0_5, %c0_6], %7 {strides = array<i32>} : memref<1x48x128xf32, #tpu.memory_space<vmem>>, vector<1x48x128xf32>,
    %8 = vector.extract_strided_slice %3 {offsets = [0, 128], sizes = [48, 128], strides = [1, 1]} : vector<48x256xf32> to vector<48x128xf32>
    %c0_7 = arith.constant 0 : index
    %c0_8 = arith.constant 0 : index
    %c0_9 = arith.constant 0 : index
    %9 = vector.load %arg5[%c0_7, %c0_8, %c0_9] : memref<1x48x128xf32, #tpu.memory_space<vmem>>, vector<1x48x128xf32>
    %10 = vector.shape_cast %9 : vector<1x48x128xf32> to vector<48x128xf32>
    %11 = vector.shape_cast %8 : vector<48x128xf32> to vector<1x48x128xf32>
    tpu.vector_store %arg5[%c0_7, %c0_8, %c0_9], %11 {strides = array<i32>} : memref<1x48x128xf32, #tpu.memory_space<vmem>>, vector<1x48x128xf32>,
    %cst_10 = arith.constant dense<0.000000e+00> : vector<128xf32>
    %12 = vector.multi_reduction <add>, %4, %cst_10 [0] : vector<48x128xf32> to vector<128xf32>
    %13 = vector.shape_cast %12 : vector<128xf32> to vector<1x128xf32>
    %14 = arith.mulf %4, %4 : vector<48x128xf32>
    %cst_11 = arith.constant dense<0.000000e+00> : vector<128xf32>
    %15 = vector.multi_reduction <add>, %14, %cst_11 [0] : vector<48x128xf32> to vector<128xf32>
    %16 = vector.shape_cast %15 : vector<128xf32> to vector<1x128xf32>
    %c0_i32 = arith.constant 0 : i32
    %17 = arith.cmpi eq, %arg1, %c0_i32 : i32
    %18 = arith.extui %17 : i1 to i32
    %c0_i32_12 = arith.constant 0 : i32
    %19 = arith.cmpi ne, %18, %c0_i32_12 : i32
    scf.if %19 {
      %cst_19 = arith.constant 0.000000e+00 : f32
      %25 = vector.broadcast %cst_19 : f32 to vector<1x2x128xf32>
      %c0_20 = arith.constant 0 : index
      %c0_21 = arith.constant 0 : index
      %c0_22 = arith.constant 0 : index
      %26 = vector.load %arg6[%c0_20, %c0_21, %c0_22] : memref<1x2x128xf32, #tpu.memory_space<vmem>>, vector<1x2x128xf32>
      tpu.vector_store %arg6[%c0_20, %c0_21, %c0_22], %25 {strides = array<i32>} : memref<1x2x128xf32, #tpu.memory_space<vmem>>, vector<1x2x128xf32>,
    } else {
    }
    %c0_13 = arith.constant 0 : index
    %c0_14 = arith.constant 0 : index
    %c0_15 = arith.constant 0 : index
    %20 = vector.load %arg6[%c0_13, %c0_14, %c0_15] : memref<1x2x128xf32, #tpu.memory_space<vmem>>, vector<1x2x128xf32>
    %21 = tpu.concatenate %13, %16 in 0 : vector<1x128xf32>, vector<1x128xf32> -> vector<2x128xf32>
    %22 = vector.shape_cast %21 : vector<2x128xf32> to vector<1x2x128xf32>
    %23 = arith.addf %20, %22 : vector<1x2x128xf32>
    %c0_16 = arith.constant 0 : index
    %c0_17 = arith.constant 0 : index
    %c0_18 = arith.constant 0 : index
    %24 = vector.load %arg6[%c0_16, %c0_17, %c0_18] : memref<1x2x128xf32, #tpu.memory_space<vmem>>, vector<1x2x128xf32>
    tpu.vector_store %arg6[%c0_16, %c0_17, %c0_18], %23 {strides = array<i32>} : memref<1x2x128xf32, #tpu.memory_space<vmem>>, vector<1x2x128xf32>,
    return
  }
  func.func @transform_0(%arg0: i32, %arg1: i32) -> (i32, i32, i32) {
    %c0_i32 = arith.constant 0 : i32
    %c0_i32_0 = arith.constant 0 : i32
    return %arg0, %arg1, %c0_i32 : i32, i32, i32
  }
  func.func @transform_1(%arg0: i32, %arg1: i32) -> (i32, i32) {
    %c0_i32 = arith.constant 0 : i32
    %c0_i32_0 = arith.constant 0 : i32
    %c0_i32_1 = arith.constant 0 : i32
    return %c0_i32, %c0_i32_0 : i32, i32
  }
  func.func @transform_2(%arg0: i32, %arg1: i32) -> (i32, i32, i32) {
    %c0_i32 = arith.constant 0 : i32
    %c0_i32_0 = arith.constant 0 : i32
    return %arg0, %arg1, %c0_i32 : i32, i32, i32
  }
  func.func @transform_3(%arg0: i32, %arg1: i32) -> (i32, i32, i32) {
    %c0_i32 = arith.constant 0 : i32
    %c0_i32_0 = arith.constant 0 : i32
    return %arg0, %arg1, %c0_i32 : i32, i32, i32
  }
  func.func @transform_4(%arg0: i32, %arg1: i32) -> (i32, i32, i32) {
    %c0_i32 = arith.constant 0 : i32
    %c0_i32_0 = arith.constant 0 : i32
    %c0_i32_1 = arith.constant 0 : i32
    return %arg0, %c0_i32, %c0_i32_0 : i32, i32, i32
  }
}

module attributes {stable_mosaic.version = 11 : i64} {
  func.func @_pass2_kernel(%arg0: i32, %arg1: i32, %arg2: memref<1x48x128xf32, #tpu.memory_space<vmem>>, %arg3: memref<1x128xf32, #tpu.memory_space<vmem>>, %arg4: memref<1x128xf32, #tpu.memory_space<vmem>>, %arg5: memref<1xf32, #tpu.memory_space<smem>>, %arg6: memref<128x128xbf16, #tpu.memory_space<vmem>>, %arg7: memref<1x48x128xf32, #tpu.memory_space<vmem>>, %arg8: memref<1x2x128xf32, #tpu.memory_space<vmem>>) attributes {dimension_semantics = [#tpu.dimension_semantics<parallel>, #tpu.dimension_semantics<arbitrary>], iteration_bounds = array<i64: 2, 1>, scalar_prefetch = 0 : i64, scratch_operands = 0 : i64, tpu.core_type = #tpu.core_type<tc>, window_params = [{transform_indices = @transform_0, window_bounds = array<i64: 1, 48, 128>}, {pipeline_mode = #tpu.pipeline_mode<synchronous>, transform_indices = @transform_1, window_bounds = array<i64: 1, 128>}, {pipeline_mode = #tpu.pipeline_mode<synchronous>, transform_indices = @transform_2, window_bounds = array<i64: 1, 128>}, {transform_indices = @transform_3, window_bounds = array<i64: 1>}, {pipeline_mode = #tpu.pipeline_mode<synchronous>, transform_indices = @transform_4, window_bounds = array<i64: 128, 128>}, {transform_indices = @transform_5, window_bounds = array<i64: 1, 48, 128>}, {transform_indices = @transform_6, window_bounds = array<i64: 1, 2, 128>}]} {
    %c0 = arith.constant 0 : index
    %c0_0 = arith.constant 0 : index
    %c0_1 = arith.constant 0 : index
    %0 = vector.load %arg2[%c0, %c0_0, %c0_1] : memref<1x48x128xf32, #tpu.memory_space<vmem>>, vector<1x48x128xf32>
    %1 = vector.shape_cast %0 : vector<1x48x128xf32> to vector<48x128xf32>
    %c0_2 = arith.constant 0 : index
    %c0_3 = arith.constant 0 : index
    %2 = vector.load %arg3[%c0_2, %c0_3] : memref<1x128xf32, #tpu.memory_space<vmem>>, vector<1x128xf32>
    %3 = vector.broadcast %2 : vector<1x128xf32> to vector<48x128xf32>
    %4 = arith.mulf %1, %3 : vector<48x128xf32>
    %c0_4 = arith.constant 0 : index
    %c0_5 = arith.constant 0 : index
    %5 = vector.load %arg4[%c0_4, %c0_5] : memref<1x128xf32, #tpu.memory_space<vmem>>, vector<1x128xf32>
    %6 = vector.broadcast %5 : vector<1x128xf32> to vector<48x128xf32>
    %7 = arith.addf %4, %6 : vector<48x128xf32>
    %c0_6 = arith.constant 0 : index
    %8 = memref.load %arg5[%c0_6] : memref<1xf32, #tpu.memory_space<smem>>
    %cst = arith.constant 0.000000e+00 : f32
    %9 = vector.broadcast %cst : f32 to vector<48x128xf32>
    %10 = arith.cmpf oge, %7, %9 : vector<48x128xf32>
    %11 = vector.broadcast %8 : f32 to vector<48x128xf32>
    %12 = arith.mulf %11, %7 : vector<48x128xf32>
    %13 = arith.select %10, %7, %12 : vector<48x128xi1>, vector<48x128xf32>
    %c48_i32 = arith.constant 48 : i32
    %14 = arith.muli %arg1, %c48_i32 : i32
    %15 = tpu.iota {dimensions = array<i32: 0>} : vector<48x1xi32>
    %16 = vector.broadcast %14 : i32 to vector<48x1xi32>
    %17 = arith.addi %16, %15 : vector<48x1xi32>
    %c24_i32 = arith.constant 24 : i32
    %18 = vector.broadcast %c24_i32 : i32 to vector<48x1xi32>
    %19 = arith.cmpi slt, %17, %18 : vector<48x1xi32>
    %cst_7 = arith.constant 0.000000e+00 : f32
    %20 = vector.shape_cast %19 : vector<48x1xi1> to vector<48x1xi1>
    %21 = vector.broadcast %20 : vector<48x1xi1> to vector<48x128xi1>
    %22 = vector.broadcast %cst_7 : f32 to vector<48x128xf32>
    %23 = arith.select %21, %13, %22 : vector<48x128xi1>, vector<48x128xf32>
    %24 = arith.truncf %23 : vector<48x128xf32> to vector<48x128xbf16>
    %c0_8 = arith.constant 0 : index
    %c0_9 = arith.constant 0 : index
    %25 = vector.load %arg6[%c0_8, %c0_9] : memref<128x128xbf16, #tpu.memory_space<vmem>>, vector<128x128xbf16>
    %cst_10 = arith.constant dense<0.000000e+00> : vector<48x128xf32>
    %26 = tpu.matmul %24, %25, %cst_10 {dimension_numbers = #tpu.dot_dimension_numbers<[1], [0], [0], [1], [0, 0, 1, 1], [], []>} : vector<48x128xbf16>, vector<128x128xbf16>, vector<48x128xf32> -> vector<48x128xf32>
    %c0_11 = arith.constant 0 : index
    %c0_12 = arith.constant 0 : index
    %c0_13 = arith.constant 0 : index
    %27 = vector.load %arg7[%c0_11, %c0_12, %c0_13] : memref<1x48x128xf32, #tpu.memory_space<vmem>>, vector<1x48x128xf32>
    %28 = vector.shape_cast %27 : vector<1x48x128xf32> to vector<48x128xf32>
    %29 = vector.shape_cast %26 : vector<48x128xf32> to vector<1x48x128xf32>
    tpu.vector_store %arg7[%c0_11, %c0_12, %c0_13], %29 {strides = array<i32>} : memref<1x48x128xf32, #tpu.memory_space<vmem>>, vector<1x48x128xf32>,
    %cst_14 = arith.constant dense<0.000000e+00> : vector<128xf32>
    %30 = vector.multi_reduction <add>, %26, %cst_14 [0] : vector<48x128xf32> to vector<128xf32>
    %31 = vector.shape_cast %30 : vector<128xf32> to vector<1x128xf32>
    %32 = arith.mulf %26, %26 : vector<48x128xf32>
    %cst_15 = arith.constant dense<0.000000e+00> : vector<128xf32>
    %33 = vector.multi_reduction <add>, %32, %cst_15 [0] : vector<48x128xf32> to vector<128xf32>
    %34 = vector.shape_cast %33 : vector<128xf32> to vector<1x128xf32>
    %c0_i32 = arith.constant 0 : i32
    %35 = arith.cmpi eq, %arg1, %c0_i32 : i32
    %36 = arith.extui %35 : i1 to i32
    %c0_i32_16 = arith.constant 0 : i32
    %37 = arith.cmpi ne, %36, %c0_i32_16 : i32
    scf.if %37 {
      %cst_23 = arith.constant 0.000000e+00 : f32
      %43 = vector.broadcast %cst_23 : f32 to vector<1x2x128xf32>
      %c0_24 = arith.constant 0 : index
      %c0_25 = arith.constant 0 : index
      %c0_26 = arith.constant 0 : index
      %44 = vector.load %arg8[%c0_24, %c0_25, %c0_26] : memref<1x2x128xf32, #tpu.memory_space<vmem>>, vector<1x2x128xf32>
      tpu.vector_store %arg8[%c0_24, %c0_25, %c0_26], %43 {strides = array<i32>} : memref<1x2x128xf32, #tpu.memory_space<vmem>>, vector<1x2x128xf32>,
    } else {
    }
    %c0_17 = arith.constant 0 : index
    %c0_18 = arith.constant 0 : index
    %c0_19 = arith.constant 0 : index
    %38 = vector.load %arg8[%c0_17, %c0_18, %c0_19] : memref<1x2x128xf32, #tpu.memory_space<vmem>>, vector<1x2x128xf32>
    %39 = tpu.concatenate %31, %34 in 0 : vector<1x128xf32>, vector<1x128xf32> -> vector<2x128xf32>
    %40 = vector.shape_cast %39 : vector<2x128xf32> to vector<1x2x128xf32>
    %41 = arith.addf %38, %40 : vector<1x2x128xf32>
    %c0_20 = arith.constant 0 : index
    %c0_21 = arith.constant 0 : index
    %c0_22 = arith.constant 0 : index
    %42 = vector.load %arg8[%c0_20, %c0_21, %c0_22] : memref<1x2x128xf32, #tpu.memory_space<vmem>>, vector<1x2x128xf32>
    tpu.vector_store %arg8[%c0_20, %c0_21, %c0_22], %41 {strides = array<i32>} : memref<1x2x128xf32, #tpu.memory_space<vmem>>, vector<1x2x128xf32>,
    return
  }
  func.func @transform_0(%arg0: i32, %arg1: i32) -> (i32, i32, i32) {
    %c0_i32 = arith.constant 0 : i32
    %c0_i32_0 = arith.constant 0 : i32
    return %arg0, %arg1, %c0_i32 : i32, i32, i32
  }
  func.func @transform_1(%arg0: i32, %arg1: i32) -> (i32, i32) {
    %c0_i32 = arith.constant 0 : i32
    %c0_i32_0 = arith.constant 0 : i32
    %c0_i32_1 = arith.constant 0 : i32
    return %c0_i32, %c0_i32_0 : i32, i32
  }
  func.func @transform_2(%arg0: i32, %arg1: i32) -> (i32, i32) {
    %c0_i32 = arith.constant 0 : i32
    %c0_i32_0 = arith.constant 0 : i32
    %c0_i32_1 = arith.constant 0 : i32
    return %c0_i32, %c0_i32_0 : i32, i32
  }
  func.func @transform_3(%arg0: i32, %arg1: i32) -> i32 {
    %c0_i32 = arith.constant 0 : i32
    %c0_i32_0 = arith.constant 0 : i32
    return %c0_i32 : i32
  }
  func.func @transform_4(%arg0: i32, %arg1: i32) -> (i32, i32) {
    %c0_i32 = arith.constant 0 : i32
    %c0_i32_0 = arith.constant 0 : i32
    %c0_i32_1 = arith.constant 0 : i32
    return %c0_i32, %c0_i32_0 : i32, i32
  }
  func.func @transform_5(%arg0: i32, %arg1: i32) -> (i32, i32, i32) {
    %c0_i32 = arith.constant 0 : i32
    %c0_i32_0 = arith.constant 0 : i32
    return %arg0, %arg1, %c0_i32 : i32, i32, i32
  }
  func.func @transform_6(%arg0: i32, %arg1: i32) -> (i32, i32, i32) {
    %c0_i32 = arith.constant 0 : i32
    %c0_i32_0 = arith.constant 0 : i32
    %c0_i32_1 = arith.constant 0 : i32
    return %arg0, %c0_i32, %c0_i32_0 : i32, i32, i32
  }
}

module attributes {stable_mosaic.version = 11 : i64} {
  func.func @_pass3_kernel(%arg0: i32, %arg1: i32, %arg2: memref<1x16x384xf32, #tpu.memory_space<vmem>>, %arg3: memref<1x16x384xf32, #tpu.memory_space<vmem>>, %arg4: memref<1x128xf32, #tpu.memory_space<vmem>>, %arg5: memref<1x128xf32, #tpu.memory_space<vmem>>, %arg6: memref<1xf32, #tpu.memory_space<smem>>, %arg7: memref<1x16x128xf32, #tpu.memory_space<vmem>>) attributes {dimension_semantics = [#tpu.dimension_semantics<parallel>, #tpu.dimension_semantics<parallel>], iteration_bounds = array<i64: 2, 1>, scalar_prefetch = 0 : i64, scratch_operands = 0 : i64, tpu.core_type = #tpu.core_type<tc>, window_params = [{transform_indices = @transform_0, window_bounds = array<i64: 1, 16, 384>}, {transform_indices = @transform_1, window_bounds = array<i64: 1, 16, 384>}, {pipeline_mode = #tpu.pipeline_mode<synchronous>, transform_indices = @transform_2, window_bounds = array<i64: 1, 128>}, {pipeline_mode = #tpu.pipeline_mode<synchronous>, transform_indices = @transform_3, window_bounds = array<i64: 1, 128>}, {transform_indices = @transform_4, window_bounds = array<i64: 1>}, {transform_indices = @transform_5, window_bounds = array<i64: 1, 16, 128>}]} {
    %c0 = arith.constant 0 : index
    %c0_0 = arith.constant 0 : index
    %c0_1 = arith.constant 0 : index
    %0 = vector.load %arg2[%c0, %c0_0, %c0_1] : memref<1x16x384xf32, #tpu.memory_space<vmem>>, vector<1x16x384xf32>
    %1 = vector.shape_cast %0 : vector<1x16x384xf32> to vector<16x384xf32>
    %c0_2 = arith.constant 0 : index
    %c0_3 = arith.constant 0 : index
    %c0_4 = arith.constant 0 : index
    %2 = vector.load %arg3[%c0_2, %c0_3, %c0_4] : memref<1x16x384xf32, #tpu.memory_space<vmem>>, vector<1x16x384xf32>
    %3 = vector.shape_cast %2 : vector<1x16x384xf32> to vector<16x384xf32>
    %c0_5 = arith.constant 0 : index
    %c0_6 = arith.constant 0 : index
    %4 = vector.load %arg4[%c0_5, %c0_6] : memref<1x128xf32, #tpu.memory_space<vmem>>, vector<1x128xf32>
    %c0_7 = arith.constant 0 : index
    %c0_8 = arith.constant 0 : index
    %5 = vector.load %arg5[%c0_7, %c0_8] : memref<1x128xf32, #tpu.memory_space<vmem>>, vector<1x128xf32>
    %c0_9 = arith.constant 0 : index
    %6 = memref.load %arg6[%c0_9] : memref<1xf32, #tpu.memory_space<smem>>
    %7 = vector.extract_strided_slice %1 {offsets = [0, 0], sizes = [16, 128], strides = [1, 1]} : vector<16x384xf32> to vector<16x128xf32>
    %8 = vector.broadcast %4 : vector<1x128xf32> to vector<16x128xf32>
    %9 = arith.mulf %7, %8 : vector<16x128xf32>
    %10 = vector.broadcast %5 : vector<1x128xf32> to vector<16x128xf32>
    %11 = arith.addf %9, %10 : vector<16x128xf32>
    %12 = vector.extract_strided_slice %3 {offsets = [0, 0], sizes = [16, 128], strides = [1, 1]} : vector<16x384xf32> to vector<16x128xf32>
    %13 = arith.addf %11, %12 : vector<16x128xf32>
    %cst = arith.constant 0.000000e+00 : f32
    %14 = vector.broadcast %cst : f32 to vector<16x128xf32>
    %15 = arith.cmpf oge, %13, %14 : vector<16x128xf32>
    %16 = vector.broadcast %6 : f32 to vector<16x128xf32>
    %17 = arith.mulf %16, %13 : vector<16x128xf32>
    %18 = arith.select %15, %13, %17 : vector<16x128xi1>, vector<16x128xf32>
    %19 = vector.extract_strided_slice %1 {offsets = [0, 128], sizes = [16, 128], strides = [1, 1]} : vector<16x384xf32> to vector<16x128xf32>
    %20 = vector.broadcast %4 : vector<1x128xf32> to vector<16x128xf32>
    %21 = arith.mulf %19, %20 : vector<16x128xf32>
    %22 = vector.broadcast %5 : vector<1x128xf32> to vector<16x128xf32>
    %23 = arith.addf %21, %22 : vector<16x128xf32>
    %24 = vector.extract_strided_slice %3 {offsets = [0, 128], sizes = [16, 128], strides = [1, 1]} : vector<16x384xf32> to vector<16x128xf32>
    %25 = arith.addf %23, %24 : vector<16x128xf32>
    %cst_10 = arith.constant 0.000000e+00 : f32
    %26 = vector.broadcast %cst_10 : f32 to vector<16x128xf32>
    %27 = arith.cmpf oge, %25, %26 : vector<16x128xf32>
    %28 = vector.broadcast %6 : f32 to vector<16x128xf32>
    %29 = arith.mulf %28, %25 : vector<16x128xf32>
    %30 = arith.select %27, %25, %29 : vector<16x128xi1>, vector<16x128xf32>
    %31 = arith.maximumf %18, %30 : vector<16x128xf32>
    %32 = vector.extract_strided_slice %1 {offsets = [0, 256], sizes = [16, 128], strides = [1, 1]} : vector<16x384xf32> to vector<16x128xf32>
    %33 = vector.broadcast %4 : vector<1x128xf32> to vector<16x128xf32>
    %34 = arith.mulf %32, %33 : vector<16x128xf32>
    %35 = vector.broadcast %5 : vector<1x128xf32> to vector<16x128xf32>
    %36 = arith.addf %34, %35 : vector<16x128xf32>
    %37 = vector.extract_strided_slice %3 {offsets = [0, 256], sizes = [16, 128], strides = [1, 1]} : vector<16x384xf32> to vector<16x128xf32>
    %38 = arith.addf %36, %37 : vector<16x128xf32>
    %cst_11 = arith.constant 0.000000e+00 : f32
    %39 = vector.broadcast %cst_11 : f32 to vector<16x128xf32>
    %40 = arith.cmpf oge, %38, %39 : vector<16x128xf32>
    %41 = vector.broadcast %6 : f32 to vector<16x128xf32>
    %42 = arith.mulf %41, %38 : vector<16x128xf32>
    %43 = arith.select %40, %38, %42 : vector<16x128xi1>, vector<16x128xf32>
    %44 = arith.maximumf %31, %43 : vector<16x128xf32>
    %c0_12 = arith.constant 0 : index
    %c0_13 = arith.constant 0 : index
    %c0_14 = arith.constant 0 : index
    %45 = vector.load %arg7[%c0_12, %c0_13, %c0_14] : memref<1x16x128xf32, #tpu.memory_space<vmem>>, vector<1x16x128xf32>
    %46 = vector.shape_cast %45 : vector<1x16x128xf32> to vector<16x128xf32>
    %47 = vector.shape_cast %44 : vector<16x128xf32> to vector<1x16x128xf32>
    tpu.vector_store %arg7[%c0_12, %c0_13, %c0_14], %47 {strides = array<i32>} : memref<1x16x128xf32, #tpu.memory_space<vmem>>, vector<1x16x128xf32>,
    return
  }
  func.func @transform_0(%arg0: i32, %arg1: i32) -> (i32, i32, i32) {
    %c0_i32 = arith.constant 0 : i32
    %c0_i32_0 = arith.constant 0 : i32
    return %arg0, %arg1, %c0_i32 : i32, i32, i32
  }
  func.func @transform_1(%arg0: i32, %arg1: i32) -> (i32, i32, i32) {
    %c0_i32 = arith.constant 0 : i32
    %c0_i32_0 = arith.constant 0 : i32
    return %arg0, %arg1, %c0_i32 : i32, i32, i32
  }
  func.func @transform_2(%arg0: i32, %arg1: i32) -> (i32, i32) {
    %c0_i32 = arith.constant 0 : i32
    %c0_i32_0 = arith.constant 0 : i32
    %c0_i32_1 = arith.constant 0 : i32
    return %c0_i32, %c0_i32_0 : i32, i32
  }
  func.func @transform_3(%arg0: i32, %arg1: i32) -> (i32, i32) {
    %c0_i32 = arith.constant 0 : i32
    %c0_i32_0 = arith.constant 0 : i32
    %c0_i32_1 = arith.constant 0 : i32
    return %c0_i32, %c0_i32_0 : i32, i32
  }
  func.func @transform_4(%arg0: i32, %arg1: i32) -> i32 {
    %c0_i32 = arith.constant 0 : i32
    %c0_i32_0 = arith.constant 0 : i32
    return %c0_i32 : i32
  }
  func.func @transform_5(%arg0: i32, %arg1: i32) -> (i32, i32, i32) {
    %c0_i32 = arith.constant 0 : i32
    %c0_i32_0 = arith.constant 0 : i32
    return %arg0, %arg1, %c0_i32 : i32, i32, i32
  }
}

</mosaic_0001>

<bundles_post_ra>
// kernel: resblock_forward.5
= control target key start
LH: loop header
LB: loop body
LE: loop exit
PB: predicated region body
PF: predicated region fallthrough
CT: control target
= control target key end

     0   :  { %s584_s20 = smov 0   ;;  %s586_s21 = smov 0   ;;  %s630_s0 = inlined_call_operand.vmem [shape: f32[2,16,384], index: 0, kind: input, shape index: {}]   ;;  %s631_s1 = inlined_call_operand.vmem [shape: f32[2,16,384], index: 1, kind: input, shape index: {}]   ;;  %s632_s2 = inlined_call_operand.vmem [shape: f32[1,128], index: 2, kind: input, shape index: {}]   ;;  %s633_s3 = inlined_call_operand.vmem [shape: f32[1,128], index: 3, kind: input, shape index: {}]   ;;  %s634_s4 = inlined_call_operand.<no memory space> [shape: f32[1], index: 4, kind: input, shape index: {}]   ;;  %s635_s5 = inlined_call_operand.vmem [shape: f32[2,16,128], index: 5, kind: output, shape index: {}]  }
   0x1   :  { %10 = sst [smem:[#allocation2]] %s634_s4  ;;  %s588_s22 = smov 0  }
   0x2 LB: > { %s28_s4 = sadd.s32 1, %s545_s21  ;;  %p492_p0 = scmp.ge.s32.totalorder %s549_s22, 1  ;;  %s549_s22 = sphi %s588_s22, %s16_s22   ;;  %s545_s21 = sphi %s586_s21, %s637_s21   ;;  %s541_s20 = sphi %s584_s20, %s636_s20  }
   0x3   : > { %p30_p1 = scmp.ge.s32.totalorder %s28_s4, 2  ;;  %p228_p2 = scmp.lt.s32.totalorder %s549_s22, 3 }
   0x5   : > { %s639_s4 = smov (%p30_p1, %s28_s4), 0  ;;  %p229_p3 = pnand %p492_p0, %p228_p2 }
   0x6   : > { %p276_p4 = scmp.lt.s32.totalorder (!%p229_p3), %s541_s20, 1  ;;  %s321_s23 = sld [smem:[#allocation2]] (!%p229_p3)  ;;  %v497_v0 = vld [vmem:[%s632_s2] ss:$0 sm:$0xff] (!%p229_p3) }
   0x7   : > { %232 = sbr.rel (%p229_p3) target bundleno = 37 (0x25), region = 40  ;;  %v498_v1 = vld [vmem:[%s633_s3] ss:$0 sm:$0xff] (!%p229_p3) }
   0xc   : > { %v342_v18 = vstv (!%p229_p3), %s321_s23 }
   0xe   : > { %s641_s20 = smov (!%p276_p4, %s541_s20), 1 }
   0xf   : > { %s502_s24 = smul.u32 48, %s641_s20  ;;  %s501_s10 = sshll.u32 %s641_s20, 4 }
  0x10   : > { %s305_s13 = scalar_lea.vmem %s635_s5, %s501_s10 }
  0x11   : > { %s284_s29 = scalar_lea.vmem %s630_s0, %s502_s24  ;;  %s295_s7 = scalar_lea.vmem %s631_s1, %s502_s24 }
  0x12   : > { %v307_v2 = vld [vmem:[%s284_s29] sm:$0xff]  ;;  %v308_v3 = vld [vmem:[%s284_s29 + $0x8] sm:$0xff]  ;;  %v309_v4 = vld [vmem:[%s284_s29 + $0x10] sm:$0xff] }
  0x13   : > { %v313_v5 = vld [vmem:[%s295_s7] sm:$0xff]  ;;  %v314_v6 = vld [vmem:[%s295_s7 + $0x8] sm:$0xff]  ;;  %v315_v7 = vld [vmem:[%s295_s7 + $0x10] sm:$0xff]  ;;  %v328_v8 = vmul.f32 %v497_v0, %v307_v2  ;;  %v347_v9 = vmul.f32 %v497_v0, %v308_v3  ;;  %v361_v10 = vmul.f32 %v497_v0, %v309_v4 }
  0x14   : > { %v310_v11 = vld [vmem:[%s284_s29 + $0x18] sm:$0xff]  ;;  %v311_v12 = vld [vmem:[%s284_s29 + $0x20] sm:$0xff]  ;;  %v312_v13 = vld [vmem:[%s284_s29 + $0x28] sm:$0xff] }
  0x15   : > { %v336_v14 = vadd.f32 %v498_v1, %v328_v8  ;;  %v349_v15 = vadd.f32 %v498_v1, %v347_v9  ;;  %v363_v16 = vadd.f32 %v498_v1, %v361_v10  ;;  %v329_v17 = vmul.f32 %v497_v0, %v310_v11  ;;  %v316_v24 = vld [vmem:[%s295_s7 + $0x18] sm:$0xff]  ;;  %v317_v25 = vld [vmem:[%s295_s7 + $0x20] sm:$0xff]  ;;  %v318_v27 = vld [vmem:[%s295_s7 + $0x28] sm:$0xff] }
  0x16   : > { %v348_v19 = vmul.f32 %v497_v0, %v311_v12  ;;  %v362_v20 = vmul.f32 %v497_v0, %v312_v13 }
  0x17   : > { %v338_v21 = vadd.f32 %v336_v14, %v313_v5  ;;  %v351_v22 = vadd.f32 %v349_v15, %v314_v6  ;;  %v365_v23 = vadd.f32 %v363_v16, %v315_v7  ;;  %v337_v26 = vadd.f32 %v498_v1, %v329_v17 }
  0x18   : > { %v350_v28 = vadd.f32 %v498_v1, %v348_v19  ;;  %v364_v29 = vadd.f32 %v498_v1, %v362_v20 }
  0x19   : > { %vm340_vm0 = vcmp.ge.f32.partialorder %v338_v21, 0.0  ;;  %v343_v30 = vmul.f32 %v342_v18, %v338_v21  ;;  %vm353_vm1 = vcmp.ge.f32.partialorder %v351_v22, 0.0  ;;  %v355_v31 = vmul.f32 %v351_v22, %v342_v18 }
  0x1a   : > { %vm367_vm2 = vcmp.ge.f32.partialorder %v365_v23, 0.0  ;;  %v369_v32 = vmul.f32 %v365_v23, %v342_v18  ;;  %v339_v33 = vadd.f32 %v337_v26, %v316_v24  ;;  %v352_v34 = vadd.f32 %v350_v28, %v317_v25 }
  0x1b   : > { %v345_v35 = vsel %vm340_vm0, %v338_v21, %v343_v30  ;;  %v357_v36 = vsel %vm353_vm1, %v351_v22, %v355_v31  ;;  %v366_v37 = vadd.f32 %v364_v29, %v318_v27 }
  0x1c   : > { %v359_v38 = vmax.f32 %v345_v35, %v357_v36  ;;  %v371_v39 = vsel %vm367_vm2, %v365_v23, %v369_v32  ;;  %vm341_vm3 = vcmp.ge.f32.partialorder %v339_v33, 0.0  ;;  %v344_v40 = vmul.f32 %v342_v18, %v339_v33 }
  0x1d   : > { %vm354_vm4 = vcmp.ge.f32.partialorder %v352_v34, 0.0  ;;  %v356_v41 = vmul.f32 %v352_v34, %v342_v18  ;;  %vm368_vm5 = vcmp.ge.f32.partialorder %v366_v37, 0.0  ;;  %v370_v42 = vmul.f32 %v366_v37, %v342_v18 }
  0x1e   : > { %v373_v43 = vmax.f32 %v359_v38, %v371_v39  ;;  %v346_v44 = vsel %vm341_vm3, %v339_v33, %v344_v40 }
  0x1f   : > { %v358_v45 = vsel %vm354_vm4, %v352_v34, %v356_v41  ;;  %v372_v46 = vsel %vm368_vm5, %v366_v37, %v370_v42 }
  0x20   : > { %375 = vst [vmem:[%s305_s13] sm:$0xff] %v373_v43  ;;  %v360_v47 = vmax.f32 %v346_v44, %v358_v45 }
  0x22   : > { %v374_v48 = vmax.f32 %v360_v47, %v372_v46 }
  0x24   : > { %376 = vst [vmem:[%s305_s13 + $0x8] sm:$0xff] %v374_v48 }
  0x25 PF: > { %s16_s22 = sadd.s32 1, %s549_s22   ;;  %s636_s20 = smov %s545_s21 }
  0x26   : > { %p13_p5 = scmp.ge.s32.totalorder %s16_s22, 4   ;;  %s637_s21 = smov %s639_s4 }
  0x28   :  { %15 = sbr.rel (!%p13_p5) target bundleno = 2 (0x2), region = 73 }

// kernel: resblock_forward.3
= control target key start
LH: loop header
LB: loop body
LE: loop exit
PB: predicated region body
PF: predicated region fallthrough
CT: control target
= control target key end

     0   :  { %s702_s15 = smov 0   ;;  %s704_s16 = smov 0   ;;  %s768_s0 = inlined_call_operand.vmem [shape: bf16[2,48,16], index: 0, kind: input, shape index: {}]   ;;  %s769_s1 = inlined_call_operand.vmem [shape: bf16[16,256], index: 1, kind: input, shape index: {}]   ;;  %s770_s2 = inlined_call_operand.vmem [shape: f32[2,48,128], index: 2, kind: output, shape index: {0}]   ;;  %s771_s3 = inlined_call_operand.vmem [shape: f32[2,48,128], index: 3, kind: output, shape index: {1}]   ;;  %s772_s4 = inlined_call_operand.vmem [shape: f32[2,2,128], index: 4, kind: output, shape index: {2}]  }
   0x1   :  { %s706_s17 = smov 0  }
   0x2 LB: > { %s27_s18 = sadd.s32 1, %s669_s16  ;;  %p600_p0 = scmp.ge.s32.totalorder %s673_s17, 1  ;;  %s673_s17 = sphi %s706_s17, %s15_s17   ;;  %s669_s16 = sphi %s704_s16, %s774_s16   ;;  %s665_s15 = sphi %s702_s15, %s773_s15  }
   0x3   : > { %p29_p1 = scmp.ge.s32.totalorder %s27_s18, 2  ;;  %p190_p2 = scmp.lt.s32.totalorder %s673_s17, 3 }
   0x5   : > { %s776_s18 = smov (%p29_p1, %s27_s18), 0  ;;  %p191_p3 = pnand %p600_p0, %p190_p2 }
   0x6   : > { %v645_v0 = vld [vmem:[%s769_s1 + $0x4] ss:$8 sps:$4 sm:$0xff] (!%p191_p3)   ;;  %p238_p4 = scmp.lt.s32.totalorder (!%p191_p3), %s665_s15, 1  ;;  %v647_v1 = vld [vmem:[%s769_s1] ss:$8 sps:$4 sm:$0xff] (!%p191_p3)   ;;  %v675_v2 = vmov (!%p191_p3), 0  }
   0x7   : > { %194 = sbr.rel (%p191_p3) target bundleno = 261 (0x105), region = 28  ;;  %347 = vmatprep.mubr.bf16.mxu0 (!%p191_p3), %v675_v2  ;;  %357 = vmatprep.mubr.bf16.mxu1 (!%p191_p3), %v675_v2  ;;  %vm305_vm0 = vcmask (!%p191_p3), 130048   ;;  %v676_v6 = vmov (!%p191_p3), 0.0   ;;  %vm424_vm1 = vcmask (!%p191_p3), 1040384  }
   0x8   : > { %315 = vmatprep.subr.bf16.mxu0 (!%p191_p3), %v645_v0  ;;  %615 = vmatprep.subr.bf16.mxu1 (!%p191_p3), %v645_v0 }
   0x9   : > { %316 = vmatpush1.bf16.msra.mxu0 (!%p191_p3), %v647_v1  ;;  %616 = vmatpush1.bf16.msra.mxu1 (!%p191_p3), %v647_v1 }
   0xe   : > { %s778_s15 = smov (!%p238_p4, %s665_s15), 1 }
   0xf   : > { %s617_s23 = smul.u32 24, %s778_s15  ;;  %s604_s27 = sshll.u32 %s778_s15, 1 }
  0x10   : > { %s732_s30 = scalar_lea.vmem %s772_s4, %s604_s27  ;;  %s618_s5 = smul.u32 48, %s778_s15 }
  0x11   : > { %s245_s26 = scalar_lea.vmem %s768_s0, %s617_s23  ;;  %422 = vst [vmem:[%s732_s30] sm:$0x3] %v676_v6 }
  0x12   : > { %v648_v3 = vld [vmem:[%s245_s26] sm:$0xff]   ;;  %v649_v4 = vld [vmem:[%s245_s26 + $0x8] sm:$0xff]   ;;  %v650_v5 = vld [vmem:[%s245_s26 + $0x10] sm:$0xff]   ;;  %s738_s8 = scalar_lea.vmem %s770_s2, %s618_s5  ;;  %s743_s11 = scalar_lea.vmem %s771_s3, %s618_s5 }
  0x13   : > { %610 = vmatmul.mubr.msk.bf16.vlgmr.msra.gmra.mrb[0].mxu0 %vm305_vm0, %v648_v3  ;;  %611 = vmatmul.mubr.msk.bf16.vlgmr.msra.gmra.mrb[0].mxu1 %vm305_vm0, %v649_v4 }
  0x14   : > { %367 = vmatprep.mubr.bf16.mxu1 %v675_v2 }
  0x18   : > { %v423_v47 = vld [vmem:[%s732_s30] sm:$0x3] }
  0x1b   : > { %612 = vmatmul.mubr.msk.bf16.gmra.mrb[4].mxu1 %vm305_vm0, %v650_v5 }
  0xe6   : > { %v349_v7 = vpop.f32.mrb[0].mxu0  ;;  %v359_v8 = vpop.f32.mrb[0].mxu1 }
  0xe7   : > { %378 = vst [vmem:[%s738_s8] sm:$0xff] %v349_v7  ;;  %v351_v9 = vpop.f32.mrb[1].mxu0  ;;  %380 = vst [vmem:[%s738_s8 + $0x10] sm:$0xff] %v359_v8  ;;  %v361_v10 = vpop.f32.mrb[1].mxu1  ;;  %v401_v12 = vmul.f32 %v349_v7, %v349_v7  ;;  %v403_v18 = vmul.f32 %v359_v8, %v359_v8 }
  0xe8   : > { %384 = vst [vmem:[%s743_s11] sm:$0xff] %v351_v9  ;;  %v353_v11 = vpop.f32.mrb[2].mxu0  ;;  %386 = vst [vmem:[%s743_s11 + $0x10] sm:$0xff] %v361_v10  ;;  %v363_v15 = vpop.f32.mrb[2].mxu1 }
  0xe9   : > { %379 = vst [vmem:[%s738_s8 + $0x8] sm:$0xff] %v353_v11  ;;  %v390_v13 = vadd.f32 %v353_v11, %v349_v7  ;;  %v402_v14 = vmul.f32 %v353_v11, %v353_v11  ;;  %v355_v16 = vpop.f32.mrb[3].mxu0  ;;  %381 = vst [vmem:[%s738_s8 + $0x18] sm:$0xff] %v363_v15  ;;  %v365_v17 = vpop.f32.mrb[3].mxu1  ;;  %v404_v22 = vmul.f32 %v363_v15, %v363_v15 }
  0xea   : > { %385 = vst [vmem:[%s743_s11 + $0x8] sm:$0xff] %v355_v16  ;;  %387 = vst [vmem:[%s743_s11 + $0x18] sm:$0xff] %v365_v17 }
  0xeb   : > { %v407_v19 = vadd.f32 %v402_v14, %v401_v12  ;;  %v391_v20 = vadd.f32 %v390_v13, %v359_v8 }
  0xed   : > { %v392_v21 = vadd.f32 %v391_v20, %v363_v15  ;;  %v408_v23 = vadd.f32 %v407_v19, %v403_v18 }
  0xee   : > { %v369_v25 = vpop.f32.mrb[4].mxu1 }
  0xef   : > { %v409_v24 = vadd.f32 %v408_v23, %v404_v22  ;;  %382 = vst [vmem:[%s738_s8 + $0x20] sm:$0xff] %v369_v25  ;;  %v393_v26 = vadd.f32 %v392_v21, %v369_v25  ;;  %v405_v27 = vmul.f32 %v369_v25, %v369_v25  ;;  %v371_v28 = vpop.f32.mrb[5].mxu1 }
  0xf0   : > { %388 = vst [vmem:[%s743_s11 + $0x20] sm:$0xff] %v371_v28  ;;  %v373_v29 = vpop.f32.mrb[6].mxu1 }
  0xf1   : > { %v410_v30 = vadd.f32 %v409_v24, %v405_v27  ;;  %383 = vst [vmem:[%s738_s8 + $0x28] sm:$0xff] %v373_v29  ;;  %v394_v31 = vadd.f32 %v393_v26, %v373_v29  ;;  %v406_v32 = vmul.f32 %v373_v29, %v373_v29  ;;  %v375_v33 = vpop.f32.mrb[7].mxu1 }
  0xf2   : > { %389 = vst [vmem:[%s743_s11 + $0x28] sm:$0xff] %v375_v33 }
  0xf3   : > { %v395_v34 = vrot.slane %v394_v31, 4  ;;  %v411_v35 = vadd.f32 %v410_v30, %v406_v32 }
  0xf5   : > { %v396_v36 = vadd.f32 %v395_v34, %v394_v31  ;;  %v412_v37 = vrot.slane %v411_v35, 4 }
  0xf7   : > { %v397_v38 = vrot.slane %v396_v36, 2  ;;  %v413_v39 = vadd.f32 %v412_v37, %v411_v35 }
  0xf9   : > { %v398_v40 = vadd.f32 %v397_v38, %v396_v36  ;;  %v414_v41 = vrot.slane %v413_v39, 2 }
  0xfb   : > { %v399_v42 = vrot.slane %v398_v40, 1  ;;  %v415_v43 = vadd.f32 %v414_v41, %v413_v39 }
  0xfd   : > { %v416_v44 = vrot.slane %v415_v43, 1  ;;  %v400_v45 = vadd.f32 %v399_v42, %v398_v40 }
  0xff   : > { %v417_v46 = vadd.f32 %v416_v44, %v415_v43 }
 0x101   : > { %v425_v48 = vsel %vm424_vm1, %v400_v45, %v417_v46 }
 0x102   : > { %v426_v49 = vadd.f32 %v425_v48, %v423_v47 }
 0x104   : > { %427 = vst [vmem:[%s732_s30] sm:$0x3] %v426_v49 }
 0x105 PF: > { %s15_s17 = sadd.s32 1, %s673_s17   ;;  %s773_s15 = smov %s669_s16 }
 0x106   : > { %p12_p5 = scmp.ge.s32.totalorder %s15_s17, 4   ;;  %s774_s16 = smov %s776_s18 }
 0x108   :  { %14 = sbr.rel (!%p12_p5) target bundleno = 2 (0x2), region = 86 }

// kernel: resblock_forward.4
= control target key start
LH: loop header
LB: loop body
LE: loop exit
PB: predicated region body
PF: predicated region fallthrough
CT: control target
= control target key end

     0   :  { %s857_s23 = smov 0   ;;  %s859_s24 = smov 0   ;;  %s960_s0 = inlined_call_operand.vmem [shape: f32[2,48,128], index: 0, kind: input, shape index: {}]   ;;  %s961_s1 = inlined_call_operand.vmem [shape: f32[1,128], index: 1, kind: input, shape index: {}]   ;;  %s962_s2 = inlined_call_operand.vmem [shape: f32[1,128], index: 2, kind: input, shape index: {}]   ;;  %s963_s3 = inlined_call_operand.<no memory space> [shape: f32[1], index: 3, kind: input, shape index: {}]   ;;  %s964_s4 = inlined_call_operand.vmem [shape: bf16[128,128], index: 4, kind: input, shape index: {}]   ;;  %s965_s5 = inlined_call_operand.vmem [shape: f32[2,48,128], index: 5, kind: output, shape index: {0}]   ;;  %s966_s6 = inlined_call_operand.vmem [shape: f32[2,2,128], index: 6, kind: output, shape index: {1}]  }
   0x1   :  { %12 = sst [smem:[#allocation2]] %s963_s3  ;;  %s861_s25 = smov 0  }
   0x2 LB: > { %s30_s3 = sadd.s32 1, %s810_s24  ;;  %p685_p0 = scmp.ge.s32.totalorder %s814_s25, 1  ;;  %s814_s25 = sphi %s861_s25, %s18_s25   ;;  %s810_s24 = sphi %s859_s24, %s968_s24   ;;  %s806_s23 = sphi %s857_s23, %s967_s23  }
   0x3   : > { %p32_p1 = scmp.ge.s32.totalorder %s30_s3, 2  ;;  %p237_p2 = scmp.lt.s32.totalorder %s814_s25, 3 }
   0x5   : > { %s970_s3 = smov (%p32_p1, %s30_s3), 0  ;;  %p238_p3 = pnand %p685_p0, %p237_p2 }
   0x6   : > { %v784_v0 = vld [vmem:[%s964_s4] sm:$0xff] (!%p238_p3)   ;;  %v816_v1 = vmov (!%p238_p3), 0.0   ;;  %v785_v2 = vld [vmem:[%s964_s4 + $0x8] sm:$0xff] (!%p238_p3)   ;;  %p280_p4 = scmp.lt.s32.totalorder (!%p238_p3), %s806_s23, 1  ;;  %vm817_vm0 = vmmov (!%p238_p3), 0   ;;  %v786_v3 = vld [vmem:[%s964_s4 + $0x10] sm:$0xff] (!%p238_p3)  }
   0x7   : > { %241 = sbr.rel (%p238_p3) target bundleno = 281 (0x119), region = 40  ;;  %712 = vmatprep.subr.bf16.mxu0 (!%p238_p3), %v816_v1  ;;  %740 = vmatprep.subr.bf16.mxu1 (!%p238_p3), %v816_v1  ;;  %v787_v4 = vld [vmem:[%s964_s4 + $0x18] sm:$0xff] (!%p238_p3)   ;;  %v689_v5 = vld [vmem:[%s961_s1] ss:$0 sm:$0xff] (!%p238_p3)  ;;  %s336_s16 = sld [smem:[#allocation2]] (!%p238_p3)  ;;  %v789_v14 = vld [vmem:[%s964_s4 + $0x28] sm:$0xff] (!%p238_p3)  }
   0x8   : > { %713 = vmatpush3.bf16.msra.mxu0 (!%p238_p3), %v784_v0  ;;  %748 = vmatpush3.bf16.msra.mxu1 (!%p238_p3), %v784_v0  ;;  %v788_v9 = vld [vmem:[%s964_s4 + $0x20] sm:$0xff] (!%p238_p3)   ;;  %v790_v19 = vld [vmem:[%s964_s4 + $0x30] sm:$0xff] (!%p238_p3)   ;;  %v791_v23 = vld [vmem:[%s964_s4 + $0x38] sm:$0xff] (!%p238_p3)   ;;  %v818_v29 = vmov (!%p238_p3), 0.0|0.0   ;;  %vm559_vm4 = vcmask (!%p238_p3), 1040384  }
   0x9   : > { %714 = vmatprep.subr.bf16.mxu0 (!%p238_p3), %v816_v1  ;;  %741 = vmatprep.subr.bf16.mxu1 (!%p238_p3), %v816_v1  ;;  %v690_v13 = vld [vmem:[%s962_s2] ss:$0 sm:$0xff] (!%p238_p3) }
   0xa   : > { %728 = vmatprep.mubr.msk.bf16.mxu0 (!%p238_p3), %vm817_vm0, %v816_v1  ;;  %732 = vmatprep.mubr.msk.bf16.mxu1 (!%p238_p3), %vm817_vm0, %v816_v1 }
   0xc   : > { %715 = vmatpush3.bf16.msra.mxu0 (!%p238_p3), %v785_v2  ;;  %749 = vmatpush3.bf16.msra.mxu1 (!%p238_p3), %v785_v2 }
   0xd   : > { %716 = vmatprep.subr.bf16.mxu0 (!%p238_p3), %v816_v1  ;;  %742 = vmatprep.subr.bf16.mxu1 (!%p238_p3), %v816_v1  ;;  %v343_v18 = vstv (!%p238_p3), %s336_s16 }
   0xe   : > { %s972_s23 = smov (!%p280_p4, %s806_s23), 1 }
   0xf   : > { %s756_s8 = smul.u32 48, %s972_s23  ;;  %s688_s30 = sshll.u32 %s972_s23, 1 }
  0x10   : > { %717 = vmatpush3.bf16.msra.mxu0 %v786_v3  ;;  %750 = vmatpush3.bf16.msra.mxu1 %v786_v3  ;;  %s940_s10 = scalar_lea.vmem %s966_s6, %s688_s30 }
  0x11   : > { %s287_s11 = scalar_lea.vmem %s960_s0, %s756_s8  ;;  %718 = vmatprep.subr.bf16.mxu0 %v816_v1  ;;  %743 = vmatprep.subr.bf16.mxu1 %v816_v1  ;;  %557 = vst [vmem:[%s940_s10] sm:$0x3] %v816_v1  ;;  %s297_s13 = scalar_lea.vmem %s965_s5, %s756_s8 }
  0x12   : > { %v304_v6 = vld [vmem:[%s287_s11] sm:$0xff]  ;;  %v305_v7 = vld [vmem:[%s287_s11 + $0x8] sm:$0xff]  ;;  %v306_v8 = vld [vmem:[%s287_s11 + $0x10] sm:$0xff] }
  0x13   : > { %v317_v10 = vmul.f32 %v689_v5, %v304_v6  ;;  %v318_v11 = vmul.f32 %v689_v5, %v305_v7  ;;  %v319_v12 = vmul.f32 %v689_v5, %v306_v8 }
  0x14   : > { %719 = vmatpush3.bf16.msra.mxu0 %v787_v4  ;;  %751 = vmatpush3.bf16.msra.mxu1 %v787_v4 }
  0x15   : > { %720 = vmatprep.subr.bf16.mxu0 %v816_v1  ;;  %744 = vmatprep.subr.bf16.mxu1 %v816_v1  ;;  %v330_v15 = vadd.f32 %v690_v13, %v317_v10  ;;  %v331_v16 = vadd.f32 %v690_v13, %v318_v11  ;;  %v332_v17 = vadd.f32 %v690_v13, %v319_v12 }
  0x17   : > { %v344_v20 = vmul.f32 %v343_v18, %v330_v15  ;;  %v345_v21 = vmul.f32 %v343_v18, %v331_v16  ;;  %v346_v22 = vmul.f32 %v343_v18, %v332_v17  ;;  %vm337_vm1 = vcmp.ge.f32.partialorder %v330_v15, 0.0 }
  0x18   : > { %721 = vmatpush3.bf16.msra.mxu0 %v788_v9  ;;  %752 = vmatpush3.bf16.msra.mxu1 %v788_v9  ;;  %vm338_vm2 = vcmp.ge.f32.partialorder %v331_v16, 0.0  ;;  %vm339_vm3 = vcmp.ge.f32.partialorder %v332_v17, 0.0  ;;  %v558_v6 = vld [vmem:[%s940_s10] sm:$0x3] }
  0x19   : > { %722 = vmatprep.subr.bf16.mxu0 %v816_v1  ;;  %745 = vmatprep.subr.bf16.mxu1 %v816_v1  ;;  %v350_v24 = vsel %vm337_vm1, %v330_v15, %v344_v20  ;;  %v351_v25 = vsel %vm338_vm2, %v331_v16, %v345_v21  ;;  %v352_v26 = vsel %vm339_vm3, %v332_v17, %v346_v22 }
  0x1a   : > { %v395_v27 = vpack.c.bf16 %v351_v25, %v350_v24  ;;  %v396_v28 = vpack.c.bf16 %v816_v1, %v352_v26 }
  0x1c   : > { %723 = vmatpush3.bf16.msra.mxu0 %v789_v14  ;;  %753 = vmatpush3.bf16.msra.mxu1 %v789_v14 }
  0x1d   : > { %724 = vmatprep.subr.bf16.mxu0 %v816_v1  ;;  %746 = vmatprep.subr.bf16.mxu1 %v816_v1 }
  0x20   : > { %725 = vmatpush3.bf16.msra.mxu0 %v790_v19  ;;  %754 = vmatpush3.bf16.msra.mxu1 %v790_v19 }
  0x21   : > { %726 = vmatprep.subr.bf16.mxu0 %v816_v1  ;;  %747 = vmatprep.subr.bf16.mxu1 %v816_v1 }
  0x24   : > { %727 = vmatpush3.bf16.msra.mxu0 %v791_v23  ;;  %755 = vmatpush3.bf16.msra.mxu1 %v791_v23 }
  0x27   : > { %729 = vmatmul.mubr.bf16.vlgmr.msra.gmra.mrb[0].mxu0 %v395_v27  ;;  %733 = vmatmul.mubr.bf16.vlgmr.msra.gmra.mrb[0].mxu1 %v396_v28 }
  0x28   : > { %736 = vmatprep.mubr.msk.bf16.mxu1 %vm817_vm0, %v816_v1 }
  0x2f   : > { %737 = vmatmul.mubr.bf16.gmra.mrb[4].mxu1 %v818_v29 }
  0xfa   : > { %v496_v30 = vpop.f32.mrb[0].mxu0  ;;  %v504_v31 = vpop.f32.mrb[0].mxu1 }
  0xfb   : > { %519 = vst [vmem:[%s297_s13] sm:$0xff] %v496_v30  ;;  %521 = vst [vmem:[%s297_s13 + $0x10] sm:$0xff] %v504_v31  ;;  %v730_v32 = vpop.f32.mrb[1].mxu0  ;;  %v734_v33 = vpop.f32.mrb[1].mxu1  ;;  %v536_v36 = vmul.f32 %v496_v30, %v496_v30  ;;  %v538_v41 = vmul.f32 %v504_v31, %v504_v31 }
  0xfc   : > { %v499_v34 = vpop.f32.mrb[2].mxu0  ;;  %v507_v35 = vpop.f32.mrb[2].mxu1 }
  0xfd   : > { %520 = vst [vmem:[%s297_s13 + $0x8] sm:$0xff] %v499_v34  ;;  %v525_v37 = vadd.f32 %v499_v34, %v496_v30  ;;  %v537_v38 = vmul.f32 %v499_v34, %v499_v34  ;;  %522 = vst [vmem:[%s297_s13 + $0x18] sm:$0xff] %v507_v35  ;;  %v731_v39 = vpop.f32.mrb[3].mxu0  ;;  %v735_v40 = vpop.f32.mrb[3].mxu1  ;;  %v539_v45 = vmul.f32 %v507_v35, %v507_v35 }
  0xff   : > { %v542_v42 = vadd.f32 %v537_v38, %v536_v36  ;;  %v526_v43 = vadd.f32 %v525_v37, %v504_v31 }
 0x101   : > { %v527_v44 = vadd.f32 %v526_v43, %v507_v35  ;;  %v543_v46 = vadd.f32 %v542_v42, %v538_v41 }
 0x102   : > { %v512_v47 = vpop.f32.mrb[4].mxu1 }
 0x103   : > { %v544_v48 = vadd.f32 %v543_v46, %v539_v45  ;;  %523 = vst [vmem:[%s297_s13 + $0x20] sm:$0xff] %v512_v47  ;;  %v528_v49 = vadd.f32 %v527_v44, %v512_v47  ;;  %v540_v50 = vmul.f32 %v512_v47, %v512_v47  ;;  %v738_v51 = vpop.f32.mrb[5].mxu1 }
 0x104   : > { %v515_v52 = vpop.f32.mrb[6].mxu1 }
 0x105   : > { %v545_v53 = vadd.f32 %v544_v48, %v540_v50  ;;  %524 = vst [vmem:[%s297_s13 + $0x28] sm:$0xff] %v515_v52  ;;  %v529_v54 = vadd.f32 %v528_v49, %v515_v52  ;;  %v541_v55 = vmul.f32 %v515_v52, %v515_v52  ;;  %v739_v56 = vpop.f32.mrb[7].mxu1 }
 0x107   : > { %v530_v57 = vrot.slane %v529_v54, 4  ;;  %v546_v58 = vadd.f32 %v545_v53, %v541_v55 }
 0x109   : > { %v531_v59 = vadd.f32 %v530_v57, %v529_v54  ;;  %v547_v60 = vrot.slane %v546_v58, 4 }
 0x10b   : > { %v532_v61 = vrot.slane %v531_v59, 2  ;;  %v548_v62 = vadd.f32 %v547_v60, %v546_v58 }
 0x10d   : > { %v533_v63 = vadd.f32 %v532_v61, %v531_v59  ;;  %v549_v0 = vrot.slane %v548_v62, 2 }
 0x10f   : > { %v534_v1 = vrot.slane %v533_v63, 1  ;;  %v550_v2 = vadd.f32 %v549_v0, %v548_v62 }
 0x111   : > { %v551_v3 = vrot.slane %v550_v2, 1  ;;  %v535_v4 = vadd.f32 %v534_v1, %v533_v63 }
 0x113   : > { %v552_v5 = vadd.f32 %v551_v3, %v550_v2 }
 0x115   : > { %v560_v7 = vsel %vm559_vm4, %v535_v4, %v552_v5 }
 0x116   : > { %v561_v8 = vadd.f32 %v560_v7, %v558_v6 }
 0x118   : > { %562 = vst [vmem:[%s940_s10] sm:$0x3] %v561_v8 }
 0x119 PF: > { %s18_s25 = sadd.s32 1, %s814_s25   ;;  %s967_s23 = smov %s810_s24 }
 0x11a   : > { %p15_p5 = scmp.ge.s32.totalorder %s18_s25, 4   ;;  %s968_s24 = smov %s970_s3 }
 0x11c   :  { %17 = sbr.rel (!%p15_p5) target bundleno = 2 (0x2), region = 86 }

</bundles_post_ra>
